<compile_context>
chip_gen: v7x
topology: tpu7x:2x2x1
jax: 0.10.0
libtpu: 0.0.40
codegen_flags: <defaults>
</compile_context>

<pallas_src>
import math
import jax
import jax.numpy as jnp
from jax.experimental import pallas as pl
from jax.experimental.pallas import tpu as pltpu


def critic_kernel(catT_ref, w1T_ref, b1_ref, w2_ref, b2_ref, o_ref):
    # Layer 1: (hidden, cat_dim) @ (cat_dim, TB) on the MXU, f32 accumulation.
    h = jnp.dot(w1T_ref[...], catT_ref[...], preferred_element_type=jnp.float32)
    h = jnp.maximum(h + b1_ref[...], 0.0)                               # ReLU (VPU), f32
    # Layer 2 (hidden -> 1): VPU broadcast-multiply + sublane reduce
    # (avoids an N=1, K=hidden MXU pass through the result FIFO).
    z = jnp.sum(h * w2_ref[...], axis=0, keepdims=True) + b2_ref[...]   # (1, TB)
    o_ref[...] = jax.nn.sigmoid(z).astype(o_ref.dtype)                  # Sigmoid (EUP), f32


def _batch_tiling(B, tb_max):
    """Pick (TB, B_pad): TB a multiple of 128 lanes, B_pad a multiple of TB, and
    (for large batches) an even grid >= 2 so v7x megacore uses both TensorCores."""
    tb_max = max(128, (int(tb_max) // 128) * 128)       # clamp to a 128-lane multiple
    b128 = pl.cdiv(B, 128) * 128
    n = pl.cdiv(b128, tb_max)
    if b128 >= 1024:                                    # big enough to split across 2 TCs
        if n < 2:
            n = 2
        elif n % 2:
            n += 1
    tb = pl.cdiv(pl.cdiv(b128, n), 128) * 128
    return tb, n * tb


def critic_func(x, y, w1, b1, w2, b2, *, compute_dtype=jnp.bfloat16, tb_max=None):
    """x: (B, x_dim), y: (B, y_dim) -> (B, 1); matches PyTorch CriticFunc.forward.

    Weight layout: w1 (cat_dim, hidden), b1 (1, hidden), w2 (hidden, 1), b2 (1, 1)
    i.e. the `x @ W` convention (== torch Linear weight transposed).
    """
    B, x_dim = x.shape
    y_dim = y.shape[1]
    cat_dim, hidden = w1.shape
    assert cat_dim == x_dim + y_dim

    itemsize = jnp.dtype(compute_dtype).itemsize
    if tb_max is None:
        # Keep per-tile activation bytes ~4 MiB regardless of dtype.
        tb_max = 65536 if itemsize <= 2 else 32768
    TB, B_pad = _batch_tiling(B, tb_max)
    pad = B_pad - B

    # Concatenated, transposed, lane-dense activations (batch -> lanes).  Kept as a
    # single fusible producer chain so XLA can fold it into the pallas operand
    # (allow_input_fusion) under jit instead of materializing an HBM copy.
    cat = jnp.concatenate([x, y], axis=-1)                                # (B, cat_dim)
    catT = jnp.pad(cat, ((0, pad), (0, 0))).T.astype(compute_dtype)       # (cat_dim, B_pad)

    # Tiny weights/biases: transpose/cast once, VMEM-resident across the whole grid.
    w1T = w1.T.astype(compute_dtype)                                      # (hidden, cat_dim)
    b1c = b1.reshape(hidden, 1).astype(jnp.float32)                       # (hidden, 1)
    w2c = w2.reshape(hidden, 1).astype(jnp.float32)                       # (hidden, 1)
    b2c = b2.reshape(1, 1).astype(jnp.float32)                            # (1, 1)

    # VMEM budget: double-buffered activation tile + double-buffered (sublane-padded)
    # f32 output tile + small resident weights.  Explicit limit so bigger tiles never
    # hit v5e's 16 MiB default scope or force reduced buffering on v7x (64 MiB phys).
    cat_dim_pad = pl.cdiv(cat_dim, 8) * 8
    est_vmem = 2 * cat_dim_pad * TB * itemsize + 2 * 8 * TB * 4 + (64 << 10)
    vmem_limit = int(min(48 << 20, max(16 << 20, 2 * est_vmem)))

    cost = pl.CostEstimate(
        flops=2 * B_pad * (cat_dim * hidden + hidden),
        transcendentals=2 * B_pad,  # sigmoid ~ exp + reciprocal per row
        bytes_accessed=catT.size * itemsize + w1T.size * itemsize
        + (b1c.size + w2c.size + b2c.size + B_pad) * 4,
    )

    out = pl.pallas_call(
        critic_kernel,
        out_shape=jax.ShapeDtypeStruct((1, B_pad), jnp.float32),
        grid=(B_pad // TB,),
        in_specs=[
            pl.BlockSpec((cat_dim, TB), lambda i: (0, i)),       # activations: tiled over batch
            pl.BlockSpec((hidden, cat_dim), lambda i: (0, 0)),   # weights/biases: resident
            pl.BlockSpec((hidden, 1), lambda i: (0, 0)),
            pl.BlockSpec((hidden, 1), lambda i: (0, 0)),
            pl.BlockSpec((1, 1), lambda i: (0, 0)),
        ],
        out_specs=pl.BlockSpec((1, TB), lambda i: (0, i)),       # lane-dense output tile
        compiler_params=pltpu.CompilerParams(
            dimension_semantics=("parallel",),                   # shard batch tiles across TCs
            allow_input_fusion=[True, False, False, False, False],
            vmem_limit_bytes=vmem_limit,
        ),
        cost_estimate=cost,
    )(catT, w1T, b1c, w2c, b2c)

    # (1, B_pad) lane-dense output -> (B, 1), dropping padded batch rows.
    return out[0, :B].reshape(B, 1)


def init_linear_params(key, fan_in, fan_out):
    # Deterministic init mimicking torch.nn.Linear defaults (uniform +-1/sqrt(fan_in)).
    kw, kb = jax.random.split(key)
    bound = 1.0 / math.sqrt(fan_in)
    # Stored as (fan_in, fan_out) so the math is x @ W (== x @ W_torch.T).
    w = jax.random.uniform(kw, (fan_in, fan_out), jnp.float32, -bound, bound)
    b = jax.random.uniform(kb, (1, fan_out), jnp.float32, -bound, bound)
    return w, b


def reference(x, y, w1, b1, w2, b2):
    cat = jnp.concatenate([x, y], axis=-1)
    h = jnp.maximum(cat @ w1 + b1, 0.0)
    return jax.nn.sigmoid(h @ w2 + b2)


if __name__ == "__main__":
    # Small shapes consistent with the module: x_dim=24, y_dim=8 -> cat_dim=32, hidden=8.
    x_dim, y_dim = 24, 8
    cat_dim = x_dim + y_dim
    hidden = cat_dim // 4

    key = jax.random.PRNGKey(0)
    kx, ky, k1, k2 = jax.random.split(key, 4)
    w1, b1 = init_linear_params(k1, cat_dim, hidden)
    w2, b2 = init_linear_params(k2, hidden, 1)

    # 1) Tiny batch, f32 path: must match the f32 reference tightly.
    B = 8
    x = jax.random.normal(kx, (B, x_dim), jnp.float32)
    y = jax.random.normal(ky, (B, y_dim), jnp.float32)
    ref = reference(x, y, w1, b1, w2, b2)
    out_f32 = jax.block_until_ready(
        critic_func(x, y, w1, b1, w2, b2, compute_dtype=jnp.float32))
    assert out_f32.shape == (B, 1), out_f32.shape
    assert jnp.allclose(out_f32, ref, atol=1e-5, rtol=1e-5), "f32 mismatch vs reference"

    # 2) Default bf16 path (HBM-bandwidth win): f32 accumulate + f32 elementwise,
    #    so only input rounding differs -> relaxed tolerance vs the f32 reference.
    out_bf16 = jax.block_until_ready(critic_func(x, y, w1, b1, w2, b2))
    assert out_bf16.shape == (B, 1), out_bf16.shape
    assert jnp.allclose(out_bf16, ref, atol=5e-2, rtol=5e-2), "bf16 mismatch vs reference"

    # 3) Multi-tile grid + non-128-multiple tb_max (exercises tiling/padding logic).
    B2 = 300
    x2 = jax.random.normal(kx, (B2, x_dim), jnp.float32)
    y2 = jax.random.normal(ky, (B2, y_dim), jnp.float32)
    ref2 = reference(x2, y2, w1, b1, w2, b2)
    out2 = jax.block_until_ready(
        critic_func(x2, y2, w1, b1, w2, b2, compute_dtype=jnp.float32, tb_max=130))
    assert out2.shape == (B2, 1), out2.shape
    assert jnp.allclose(out2, ref2, atol=1e-5, rtol=1e-5), "multi-tile mismatch vs reference"

    print("KERNEL_OK")
</pallas_src>

<mosaic_0001>
module attributes {stable_mosaic.version = 11 : i64} {
  func.func @critic_kernel(%arg0: i32, %arg1: memref<32x128xf32, #tpu.memory_space<vmem>>, %arg2: memref<8x32xf32, #tpu.memory_space<vmem>>, %arg3: memref<8x1xf32, #tpu.memory_space<vmem>>, %arg4: memref<8x1xf32, #tpu.memory_space<vmem>>, %arg5: memref<1x1xf32, #tpu.memory_space<vmem>>, %arg6: memref<1x128xf32, #tpu.memory_space<vmem>>) attributes {dimension_semantics = [#tpu.dimension_semantics<parallel>], iteration_bounds = array<i64: 1>, scalar_prefetch = 0 : i64, scratch_operands = 0 : i64, tpu.core_type = #tpu.core_type<tc>, window_params = [{transform_indices = @transform_0, window_bounds = array<i64: 32, 128>}, {pipeline_mode = #tpu.pipeline_mode<synchronous>, transform_indices = @transform_1, window_bounds = array<i64: 8, 32>}, {pipeline_mode = #tpu.pipeline_mode<synchronous>, transform_indices = @transform_2, window_bounds = array<i64: 8, 1>}, {pipeline_mode = #tpu.pipeline_mode<synchronous>, transform_indices = @transform_3, window_bounds = array<i64: 8, 1>}, {pipeline_mode = #tpu.pipeline_mode<synchronous>, transform_indices = @transform_4, window_bounds = array<i64: 1, 1>}, {transform_indices = @transform_5, window_bounds = array<i64: 1, 128>}]} {
    %c0 = arith.constant 0 : index
    %c0_0 = arith.constant 0 : index
    %0 = vector.load %arg2[%c0, %c0_0] : memref<8x32xf32, #tpu.memory_space<vmem>>, vector<8x32xf32>
    %c0_1 = arith.constant 0 : index
    %c0_2 = arith.constant 0 : index
    %1 = vector.load %arg1[%c0_1, %c0_2] : memref<32x128xf32, #tpu.memory_space<vmem>>, vector<32x128xf32>
    %cst = arith.constant dense<0.000000e+00> : vector<8x128xf32>
    %2 = tpu.matmul %0, %1, %cst {dimension_numbers = #tpu.dot_dimension_numbers<[1], [0], [0], [1], [0, 0, 1, 1], [], []>} : vector<8x32xf32>, vector<32x128xf32>, vector<8x128xf32> -> vector<8x128xf32>
    %c0_3 = arith.constant 0 : index
    %c0_4 = arith.constant 0 : index
    %3 = vector.load %arg3[%c0_3, %c0_4] : memref<8x1xf32, #tpu.memory_space<vmem>>, vector<8x1xf32>
    %4 = vector.broadcast %3 : vector<8x1xf32> to vector<8x128xf32>
    %5 = arith.addf %2, %4 : vector<8x128xf32>
    %cst_5 = arith.constant 0.000000e+00 : f32
    %6 = vector.broadcast %cst_5 : f32 to vector<8x128xf32>
    %7 = arith.maximumf %5, %6 : vector<8x128xf32>
    %c0_6 = arith.constant 0 : index
    %c0_7 = arith.constant 0 : index
    %8 = vector.load %arg4[%c0_6, %c0_7] : memref<8x1xf32, #tpu.memory_space<vmem>>, vector<8x1xf32>
    %9 = vector.broadcast %8 : vector<8x1xf32> to vector<8x128xf32>
    %10 = arith.mulf %7, %9 : vector<8x128xf32>
    %cst_8 = arith.constant dense<0.000000e+00> : vector<128xf32>
    %11 = vector.multi_reduction <add>, %10, %cst_8 [0] : vector<8x128xf32> to vector<128xf32>
    %12 = vector.shape_cast %11 : vector<128xf32> to vector<1x128xf32>
    %c0_9 = arith.constant 0 : index
    %c0_10 = arith.constant 0 : index
    %13 = vector.load %arg5[%c0_9, %c0_10] : memref<1x1xf32, #tpu.memory_space<vmem>>, vector<1x1xf32>
    %14 = vector.broadcast %13 : vector<1x1xf32> to vector<1x128xf32>
    %15 = arith.addf %12, %14 : vector<1x128xf32>
    %16 = arith.negf %15 : vector<1x128xf32>
    %17 = math.exp %16 : vector<1x128xf32>
    %cst_11 = arith.constant 1.000000e+00 : f32
    %18 = vector.broadcast %cst_11 : f32 to vector<1x128xf32>
    %19 = arith.addf %18, %17 : vector<1x128xf32>
    %20 = arith.divf %18, %19 : vector<1x128xf32>
    %c0_12 = arith.constant 0 : index
    %c0_13 = arith.constant 0 : index
    %21 = vector.load %arg6[%c0_12, %c0_13] : memref<1x128xf32, #tpu.memory_space<vmem>>, vector<1x128xf32>
    tpu.vector_store %arg6[%c0_12, %c0_13], %20 {strides = array<i32>} : memref<1x128xf32, #tpu.memory_space<vmem>>, vector<1x128xf32>,
    return
  }
  func.func @transform_0(%arg0: i32) -> (i32, i32) {
    %c0_i32 = arith.constant 0 : i32
    %c0_i32_0 = arith.constant 0 : i32
    return %c0_i32, %arg0 : i32, i32
  }
  func.func @transform_1(%arg0: i32) -> (i32, i32) {
    %c0_i32 = arith.constant 0 : i32
    %c0_i32_0 = arith.constant 0 : i32
    %c0_i32_1 = arith.constant 0 : i32
    return %c0_i32, %c0_i32_0 : i32, i32
  }
  func.func @transform_2(%arg0: i32) -> (i32, i32) {
    %c0_i32 = arith.constant 0 : i32
    %c0_i32_0 = arith.constant 0 : i32
    %c0_i32_1 = arith.constant 0 : i32
    return %c0_i32, %c0_i32_0 : i32, i32
  }
  func.func @transform_3(%arg0: i32) -> (i32, i32) {
    %c0_i32 = arith.constant 0 : i32
    %c0_i32_0 = arith.constant 0 : i32
    %c0_i32_1 = arith.constant 0 : i32
    return %c0_i32, %c0_i32_0 : i32, i32
  }
  func.func @transform_4(%arg0: i32) -> (i32, i32) {
    %c0_i32 = arith.constant 0 : i32
    %c0_i32_0 = arith.constant 0 : i32
    %c0_i32_1 = arith.constant 0 : i32
    return %c0_i32, %c0_i32_0 : i32, i32
  }
  func.func @transform_5(%arg0: i32) -> (i32, i32) {
    %c0_i32 = arith.constant 0 : i32
    %c0_i32_0 = arith.constant 0 : i32
    return %c0_i32, %arg0 : i32, i32
  }
}

</mosaic_0001>

<bundles_post_ra>
// kernel: tpu_custom_call.1
= control target key start
LH: loop header
LB: loop body
LE: loop exit
PB: predicated region body
PF: predicated region fallthrough
CT: control target
= control target key end

     0   :  { %s329_s0 = inlined_call_operand.hbm [shape: f32[32,128], index: 0, kind: input, shape index: {}]   ;;  %s330_s1 = inlined_call_operand.vmem [shape: f32[8,32], index: 1, kind: input, shape index: {}]   ;;  %s331_s2 = inlined_call_operand.vmem [shape: f32[8,1], index: 2, kind: input, shape index: {}]   ;;  %s332_s3 = inlined_call_operand.vmem [shape: f32[8,1], index: 3, kind: input, shape index: {}]   ;;  %s333_s4 = inlined_call_operand.<no memory space> [shape: f32[1,1], index: 4, kind: input, shape index: {}]   ;;  %s334_s5 = inlined_call_operand.hbm [shape: f32[1,128], index: 5, kind: output, shape index: {}]  }
   0x1   :  { %v10_v0 = vstv %s333_s4 }
   0x2   :  { %11 = vst [vmem:[#allocation2] sm:$0x1] %v10_v0 }
   0x3   :  { %12 = vsyncpa [#allocation4], 0 }
   0x4   :  { %13 = vsyncpa [#allocation5], 0  ;;  %s255_s20 = smov [#allocation3]   ;;  %s207_s24 = scalar_lea.hbm %s329_s0, 512 }
   0x5   :  { %s19_s21 = sshll.u32 %s255_s20, 4  ;;  %p208_p0 = scmp.ne.s32.totalorder %s329_s0, %s207_s24  ;;  %s20_s21 = int_to_ptr.vmem [resolvable:$true] %s19_s21 }
   0x6   :  { %p211_p1 = scmp.lt.u32.totalorder %s207_s24, %s329_s0 }
   0x8   :  { %p213_p2 = pnand %p211_p1, %p208_p0 }
   0xa   :  { %216 = shalt.err (!%p213_p2)
}
   0xb   :  { %s217_s4 = scalar_lea.vmem %s20_s21, 512  ;;  %p222_p4 = scmp.lt.s32.totalorder %s20_s21, %s20_s21 }
   0xc   :  { %p218_p3 = scmp.ne.s32.totalorder %s20_s21, %s217_s4  ;;  %p223_p5 = scmp.lt.s32.totalorder %s217_s4, %s217_s4 }
   0xe   :  { %p224_p6 = por %p223_p5, %p222_p4 }
  0x10   :  { %p225_p7 = pnand %p224_p6, %p218_p3 }
  0x12   :  { %228 = shalt.err (!%p225_p7)
}
  0x13   :  { %s256_s29 = smov 128   ;;  %s257_s30 = smov 8  }
  0x14   :  { %25 = dma.hbm_to_vmem [thread:$0]  %s329_s0, 512, %s20_s21, [#allocation4], %s256_s29, %s256_s29, %s257_s30  }
  0x15   :  { %251 = dma.done.wait [#allocation4], 512  }
  0x16   :  { %252 = vsyncadd [#allocation4], 4294966784  ;;  %v258_v1 = vmov 0.0|0.0   ;;  %vm259_vm0 = vmmov 0   ;;  %v260_v2 = vmov 0.0   ;;  %v261_v3 = vmov 0  }
  0x17   :  { %187 = vmatprep.subr.bf16.mxu0 %v258_v1  ;;  %184 = vmatprep.mubr.msk.f32.mxu0 %vm259_vm0, %v260_v2  ;;  %v38_v4 = vld [vmem:[#allocation3] sm:$0xff]  ;;  %v39_v5 = vld [vmem:[#allocation3 + $0x8] sm:$0xff]  ;;  %v40_v6 = vld [vmem:[#allocation3 + $0x10] sm:$0xff]  ;;  %vm48_vm1 = vcmask 261120   ;;  %v142_v19 = vlaneseq }
  0x18   :  { %201 = vset.pattern.permute.xlu0 %v261_v3  ;;  %202 = vset.pattern.permute.xlu1 %v261_v3  ;;  %v188_v7 = vpack.c.bf16 %v39_v5, %v38_v4  ;;  %v41_v8 = vld [vmem:[#allocation3 + $0x18] sm:$0xff] }
  0x19   :  { %v42_v9 = vld [vmem:[%s331_s2] sm:$0xff]  ;;  %v191_v11 = vpack.c.bf16 %v41_v8, %v40_v6  ;;  %v143_v23 = vshrl.u32 %v142_v19, 7 }
  0x1a   :  { %45 = vperm.xlu0 %201, %v42_v9   ;;  %v136_v10 = vld [vmem:[#allocation2] sm:$0x1]  ;;  %189 = vmatpush3.bf16.msra.mxu0 %v188_v7 }
  0x1b   :  { %v123_v12 = vld [vmem:[%s332_s3] sm:$0xff]  ;;  %139 = vperm.xlu1 %202, %v136_v10   ;;  %190 = vmatprep.subr.bf16.mxu0 %v258_v1  ;;  %v144_v26 = vsub.s32 0, %v143_v23 }
  0x1c   :  { %v37_v13 = vld [vmem:[%s330_s1] sm:$0xff]  ;;  %s262_s1 = smov [#allocation6]  }
  0x1d   :  { %s160_s2 = sshll.u32 %s262_s1, 4  ;;  %s161_s2 = int_to_ptr.vmem [resolvable:$true] %s160_s2 }
  0x1e   :  { %126 = vperm.xlu0 %201, %v123_v12   ;;  %192 = vmatpush3.bf16.msra.mxu0 %v191_v11  ;;  %s229_s3 = scalar_lea.vmem %s161_s2, 16  ;;  %s233_s13 = scalar_lea.vmem %s161_s2, 32 }
  0x1f   :  { %p230_p8 = scmp.ne.s32.totalorder %s161_s2, %s229_s3  ;;  %p234_p9 = scmp.lt.s32.totalorder %s161_s2, %s161_s2 }
  0x20   :  { %p235_p10 = scmp.lt.s32.totalorder %s233_s13, %s229_s3 }
  0x21   :  { %185 = vmatmul.mubr.msk.f32.vlgmr.msra.gmra.mrb[0].mxu0 %vm48_vm1, %v37_v13 }
  0x22   :  { %p236_p11 = por %p235_p10, %p234_p9 }
  0x24   :  { %p237_p12 = pnand %p236_p11, %p230_p8 }
  0x99   :  { %v46_v14 = vpop.permute.xlu0 %45 }
  0x9a   :  { %v140_v27 = vpop.permute.xlu1 %139 }
  0x9b   :  { %v145_v30 = vrot.slane %v140_v27, %v144_v26 }
  0x9d   :  { %v127_v20 = vpop.permute.xlu0 %126 }
  0xf4   :  { %v118_v15 = vpop.f32.mrb[0].mxu0 }
  0xf5   :  { %v119_v16 = vadd.f32 %v118_v15, %v46_v14  ;;  %v186_v17 = vpop.f32.mrb[1].mxu0 }
  0xf7   :  { %v122_v18 = vmax.f32 %v119_v16, 0.0 }
  0xf9   :  { %v129_v21 = vmul.f32 %v127_v20, %v122_v18 }
  0xfb   :  { %v130_v22 = vrot.slane %v129_v21, 4 }
  0xfd   :  { %v131_v24 = vadd.f32 %v130_v22, %v129_v21 }
  0xff   :  { %v132_v25 = vrot.slane %v131_v24, 2 }
 0x101   :  { %v133_v28 = vadd.f32 %v132_v25, %v131_v24 }
 0x103   :  { %v134_v29 = vrot.slane %v133_v28, 1 }
 0x105   :  { %v135_v31 = vadd.f32 %v134_v29, %v133_v28 }
 0x107   :  { %v146_v32 = vadd.f32 %v145_v30, %v135_v31 }
 0x109   :  { %v170_v33 = vmul.f32 -1.442695, %v146_v32 }
 0x10b   :  { %203 = vpow2.f32 %v170_v33 }
 0x115   :  { %v204_v34 = vpop.eup %203 }
 0x116   :  { %v150_v35 = vadd.f32 1.0, %v204_v34 }
 0x118   :  { %205 = vrcp.f32 %v150_v35 }
 0x122   :  { %v206_v36 = vpop.eup %205 }
 0x123   :  { %153 = vst [vmem:[#allocation6] sm:$0x1] %v206_v36 }
 0x124   :  { %240 = shalt.err (!%p237_p12)
}
 0x125   :  { %s241_s16 = scalar_lea.hbm %s334_s5, 16 }
 0x126   :  { %p242_p13 = scmp.ne.s32.totalorder %s334_s5, %s241_s16  ;;  %p245_p0 = scmp.lt.u32.totalorder %s241_s16, %s334_s5 }
 0x128   :  { %p247_p1 = pnand %p245_p0, %p242_p13 }
 0x12a   :  { %250 = shalt.err (!%p247_p1)
}
 0x12b   :  { %163 = dma.vmem_to_hbm [thread:$0]  %s161_s2, 16, %s334_s5, [#allocation5]  }
 0x12c   :  { %253 = dma.done.wait [#allocation5], 16  }
 0x12d   :  { %254 = vsyncadd [#allocation5], 4294967280 }
 0x12e   :  { %167 = vsyncpa [#allocation4], 1 }
 0x12f   :  { %168 = vsyncpa [#allocation5], 1 }

</bundles_post_ra>
